<compile_context>
chip_gen: v7x
topology: tpu7x:2x2x1
jax: 0.10.0
libtpu: 0.0.40
codegen_flags: <defaults>
</compile_context>

<pallas_src>
import math
from functools import partial

import jax
import jax.numpy as jnp
from jax.experimental import pallas as pl
from jax.experimental.pallas import tpu as pltpu

BN_EPS = 1e-5
LANE = 128


def _round_up(x, m):
    return ((x + m - 1) // m) * m


def _pad2(x, rows, cols):
    """Zero-pad a 2-D array up to (rows, cols)."""
    return jnp.pad(x, ((0, rows - x.shape[0]), (0, cols - x.shape[1])))


def graphnn_kernel(a_ref, x_ref, w1_ref, w2_ref, pp_ref, out_ref, *,
                   gpb, n, dp, hp):
    """One grid step = one block-diagonal pack of `gpb` graphs (M = gpb * n rows).

    a_ref  : (1, M, M)   block-diagonal normalized adjacency (f32)
    x_ref  : (M, Dp)     embedding table tiled gpb times (shared by all graphs)
    w1_ref : (Dp, Hp)    gnn1 weight
    w2_ref : (Hp, Dp)    gnn2 weight
    pp_ref : (8, P)      packed small params: row0 = b1, row1 = gamma, row2 = beta
    out_ref: (gpb, n, Dp)
    """
    a = a_ref[0]                                   # (M, M)
    pp = pp_ref[...]
    b1 = pp[0:1, :hp]                              # (1, Hp)
    gamma = pp[1:2, :dp]                           # (1, Dp)
    beta = pp[2:3, :dp]                            # (1, Dp)

    # --- gnn1, reassociated: (A @ X) @ W1 + b1 --------------------------------
    # Contract A against the narrow node-feature matrix first (fewer MXU pushes
    # than A @ (X @ W1), which would expand to 2D columns before the M*M pass).
    ax = jnp.dot(a, x_ref[...], preferred_element_type=jnp.float32)
    h = jnp.dot(ax, w1_ref[...], preferred_element_type=jnp.float32) + b1

    # --- dropout (eval mode => identity) ---------------------------------------
    # TODO(synk): training-mode dropout (p=0.5) would need pltpu.prng_random_bits.

    # --- gnn2: A @ (H @ W2)  (b2 omitted: it cancels exactly through BatchNorm) -
    hw = jnp.dot(h, w2_ref[...], preferred_element_type=jnp.float32)
    h2 = jnp.dot(a, hw, preferred_element_type=jnp.float32)       # (M, Dp)

    # --- BatchNorm1d: per-graph training-mode stats over that graph's n nodes ---
    # (two-pass / centered variance; gpb is tiny so the static unroll is free).
    inv_n = 1.0 / n
    for g in range(gpb):
        hg = h2[g * n:(g + 1) * n, :]                              # (n, Dp)
        mean = jnp.sum(hg, axis=0, keepdims=True) * inv_n
        c = hg - mean
        var = jnp.sum(c * c, axis=0, keepdims=True) * inv_n        # biased
        y = c * jax.lax.rsqrt(var + BN_EPS)
        out_ref[g] = gamma * y + beta


def make_graphnn_forward(emb, w1, b1, w2, gamma, beta, graphs_per_block=2):
    """Build a jitted `forward(a_hat_batch)` for a batch of graphs.

    All parameter padding / packing happens ONCE here (hoisted out of the
    per-call hot path).  `a_hat_batch` is (B, N, N) of normalized adjacencies.
    Output is (B, N, D).
    """
    n, d = emb.shape
    hid = w1.shape[1]
    dp = _round_up(d, LANE)
    hp = _round_up(hid, LANE)
    p = max(dp, hp)
    gpb = graphs_per_block
    m = gpb * n

    # Lane-dense padding (padded columns stay exactly zero end-to-end and are
    # sliced back off outside the kernel).
    x_tiled = jnp.tile(_pad2(emb, n, dp), (gpb, 1))                # (M, Dp)
    w1_p = _pad2(w1, dp, hp)                                       # (Dp, Hp)
    w2_p = _pad2(w2, hp, dp)                                       # (Hp, Dp)

    # Pack the small (1, ·) vectors into a single (8, P) tile: one DMA, one tile.
    pp = jnp.zeros((8, p), jnp.float32)
    pp = pp.at[0, :hid].set(b1.reshape(-1))
    pp = pp.at[1, :d].set(gamma.reshape(-1))
    pp = pp.at[2, :d].set(beta.reshape(-1))

    kernel = partial(graphnn_kernel, gpb=gpb, n=n, dp=dp, hp=hp)

    @jax.jit
    def forward(a_hat_batch):
        b = a_hat_batch.shape[0]
        nb = pl.cdiv(b, gpb)
        b_pad = nb * gpb
        if b_pad != b:  # pad the batch with empty graphs (zero adjacency)
            a_hat_batch = jnp.concatenate(
                [a_hat_batch.astype(jnp.float32),
                 jnp.zeros((b_pad - b, n, n), jnp.float32)], axis=0)
        else:
            a_hat_batch = a_hat_batch.astype(jnp.float32)

        # Pack gpb graphs per grid step block-diagonally along the node axis so
        # every matmul runs at M = K = gpb*n rows (MXU fill) with no cross-graph
        # mixing (off-diagonal blocks are zero).
        a4 = a_hat_batch.reshape(nb, gpb, n, n)
        a_bd = jnp.zeros((nb, m, m), jnp.float32)
        for g in range(gpb):
            a_bd = a_bd.at[:, g * n:(g + 1) * n, g * n:(g + 1) * n].set(a4[:, g])

        flops = nb * (2 * m * m * dp * 2 + 2 * m * dp * hp + 2 * m * hp * dp)
        bytes_accessed = 4 * (a_bd.size + x_tiled.size + w1_p.size + w2_p.size
                              + pp.size + b_pad * n * dp)

        out = pl.pallas_call(
            kernel,
            out_shape=jax.ShapeDtypeStruct((b_pad, n, dp), jnp.float32),
            grid_spec=pltpu.PrefetchScalarGridSpec(
                num_scalar_prefetch=0,
                grid=(nb,),
                in_specs=[
                    # per-step adjacency block
                    pl.BlockSpec((1, m, m), lambda i: (i, 0, 0)),
                    # constant index_maps -> stay VMEM-resident across the grid
                    pl.BlockSpec((m, dp), lambda i: (0, 0)),
                    pl.BlockSpec((dp, hp), lambda i: (0, 0)),
                    pl.BlockSpec((hp, dp), lambda i: (0, 0)),
                    pl.BlockSpec((8, p), lambda i: (0, 0)),
                ],
                out_specs=pl.BlockSpec((gpb, n, dp), lambda i: (i, 0, 0)),
            ),
            compiler_params=pltpu.CompilerParams(
                dimension_semantics=("parallel",)),
            cost_estimate=pl.CostEstimate(
                flops=flops,
                transcendentals=nb * gpb * dp,
                bytes_accessed=bytes_accessed),
        )(a_bd, x_tiled, w1_p, w2_p, pp)

        # NOTE(perf): on v6e/v7x, cast a_bd / x_tiled / w1_p / w2_p to bfloat16
        # at the MXU inputs (keep preferred_element_type=f32 and f32 BN math,
        # esp. on v5e whose VPU/EUP have no bf16) for ~2-3x matmul throughput;
        # kept f32 here to preserve the 1e-4 correctness check.
        return out[:b, :, :d]

    return forward


def build_normalized_adjacency(edge_index, num_nodes):
    """Dense D^{-1/2} (A + I) D^{-1/2}, torch_geometric GCNConv convention.

    edge_index: (2, E) int32, row 0 = source j, row 1 = target i.
    """
    src, dst = edge_index[0], edge_index[1]
    a = jnp.zeros((num_nodes, num_nodes), jnp.float32)
    a = a.at[dst, src].add(1.0)                       # message j -> i
    a = a + jnp.eye(num_nodes, dtype=jnp.float32)     # self loops
    deg = jnp.sum(a, axis=1)
    dinv = jnp.where(deg > 0, jax.lax.rsqrt(deg), 0.0)
    return dinv[:, None] * a * dinv[None, :]


def reference_forward(a_hat, emb, w1, b1, w2, b2, gamma, beta):
    """Pure-JAX reference for a single graph (includes the b2 add, to verify
    that it cancels exactly through BatchNorm as the kernel assumes)."""
    h = (a_hat @ emb) @ w1 + b1
    h2 = a_hat @ (h @ w2) + b2
    mean = jnp.mean(h2, axis=0, keepdims=True)
    var = jnp.mean((h2 - mean) ** 2, axis=0, keepdims=True)
    return gamma * (h2 - mean) * jax.lax.rsqrt(var + BN_EPS) + beta


if __name__ == "__main__":
    num_nodes, input_dim, num_edges = 64, 32, 128
    hidden = input_dim * 2
    num_graphs = 7          # odd on purpose: exercises the batch-padding path

    key = jax.random.PRNGKey(0)
    k_emb, k_w1, k_w2, k_b2, k_g, k_b, k_e = jax.random.split(key, 7)

    # nn.Embedding weight, xavier_normal_ init.
    std_emb = math.sqrt(2.0 / (num_nodes + input_dim))
    emb = std_emb * jax.random.normal(k_emb, (num_nodes, input_dim), jnp.float32)

    # GCNConv weights: glorot uniform (PyG default).
    lim1 = math.sqrt(6.0 / (input_dim + hidden))
    w1 = jax.random.uniform(k_w1, (input_dim, hidden), jnp.float32, -lim1, lim1)
    b1 = jnp.zeros((1, hidden), jnp.float32)
    lim2 = math.sqrt(6.0 / (hidden + input_dim))
    w2 = jax.random.uniform(k_w2, (hidden, input_dim), jnp.float32, -lim2, lim2)
    # PyG initializes b2 to zeros; we use a NONZERO b2 in the reference only, to
    # verify it cancels exactly through BatchNorm (the kernel never adds it).
    b2 = 0.1 * jax.random.normal(k_b2, (1, input_dim), jnp.float32)

    # BatchNorm1d affine params (defaults are ones/zeros; nonzero here to
    # exercise the affine path).
    gamma = 1.0 + 0.1 * jax.random.normal(k_g, (1, input_dim), jnp.float32)
    beta = 0.1 * jax.random.normal(k_b, (1, input_dim), jnp.float32)

    # Deterministic synthetic graphs: random directed edges, shared embedding.
    edge_keys = jax.random.split(k_e, num_graphs)
    a_hats = jnp.stack([
        build_normalized_adjacency(
            jax.random.randint(ek, (2, num_edges), 0, num_nodes, jnp.int32),
            num_nodes)
        for ek in edge_keys])                                    # (B, N, N)

    forward = make_graphnn_forward(emb, w1, b1, w2, gamma, beta,
                                   graphs_per_block=2)
    out = jax.block_until_ready(forward(a_hats))

    assert out.shape == (num_graphs, num_nodes, input_dim)
    for g in range(num_graphs):
        ref = reference_forward(a_hats[g], emb, w1, b1, w2, b2, gamma, beta)
        assert jnp.allclose(out[g], ref, atol=1e-4, rtol=1e-4), \
            f"mismatch vs JAX reference on graph {g}"

    print("KERNEL_OK")
</pallas_src>

<mosaic_0001>
module attributes {stable_mosaic.version = 11 : i64} {
  func.func @graphnn_kernel(%arg0: i32, %arg1: memref<1x128x128xf32, #tpu.memory_space<vmem>>, %arg2: memref<128x128xf32, #tpu.memory_space<vmem>>, %arg3: memref<128x128xf32, #tpu.memory_space<vmem>>, %arg4: memref<128x128xf32, #tpu.memory_space<vmem>>, %arg5: memref<8x128xf32, #tpu.memory_space<vmem>>, %arg6: memref<2x64x128xf32, #tpu.memory_space<vmem>>) attributes {dimension_semantics = [#tpu.dimension_semantics<parallel>], iteration_bounds = array<i64: 4>, scalar_prefetch = 0 : i64, scratch_operands = 0 : i64, tpu.core_type = #tpu.core_type<tc>, window_params = [{transform_indices = @transform_0, window_bounds = array<i64: 1, 128, 128>}, {pipeline_mode = #tpu.pipeline_mode<synchronous>, transform_indices = @transform_1, window_bounds = array<i64: 128, 128>}, {pipeline_mode = #tpu.pipeline_mode<synchronous>, transform_indices = @transform_2, window_bounds = array<i64: 128, 128>}, {pipeline_mode = #tpu.pipeline_mode<synchronous>, transform_indices = @transform_3, window_bounds = array<i64: 128, 128>}, {pipeline_mode = #tpu.pipeline_mode<synchronous>, transform_indices = @transform_4, window_bounds = array<i64: 8, 128>}, {transform_indices = @transform_5, window_bounds = array<i64: 2, 64, 128>}]} {
    %c0 = arith.constant 0 : index
    %c0_0 = arith.constant 0 : index
    %c0_1 = arith.constant 0 : index
    %0 = vector.load %arg1[%c0, %c0_0, %c0_1] : memref<1x128x128xf32, #tpu.memory_space<vmem>>, vector<1x128x128xf32>
    %1 = vector.shape_cast %0 : vector<1x128x128xf32> to vector<128x128xf32>
    %c0_2 = arith.constant 0 : index
    %c0_3 = arith.constant 0 : index
    %2 = vector.load %arg5[%c0_2, %c0_3] : memref<8x128xf32, #tpu.memory_space<vmem>>, vector<8x128xf32>
    %3 = vector.extract_strided_slice %2 {offsets = [0, 0], sizes = [1, 128], strides = [1, 1]} : vector<8x128xf32> to vector<1x128xf32>
    %4 = vector.extract_strided_slice %2 {offsets = [1, 0], sizes = [1, 128], strides = [1, 1]} : vector<8x128xf32> to vector<1x128xf32>
    %5 = vector.extract_strided_slice %2 {offsets = [2, 0], sizes = [1, 128], strides = [1, 1]} : vector<8x128xf32> to vector<1x128xf32>
    %c0_4 = arith.constant 0 : index
    %c0_5 = arith.constant 0 : index
    %6 = vector.load %arg2[%c0_4, %c0_5] : memref<128x128xf32, #tpu.memory_space<vmem>>, vector<128x128xf32>
    %cst = arith.constant dense<0.000000e+00> : vector<128x128xf32>
    %7 = tpu.matmul %1, %6, %cst {dimension_numbers = #tpu.dot_dimension_numbers<[1], [0], [0], [1], [0, 0, 1, 1], [], []>} : vector<128x128xf32>, vector<128x128xf32>, vector<128x128xf32> -> vector<128x128xf32>
    %c0_6 = arith.constant 0 : index
    %c0_7 = arith.constant 0 : index
    %8 = vector.load %arg3[%c0_6, %c0_7] : memref<128x128xf32, #tpu.memory_space<vmem>>, vector<128x128xf32>
    %cst_8 = arith.constant dense<0.000000e+00> : vector<128x128xf32>
    %9 = tpu.matmul %7, %8, %cst_8 {dimension_numbers = #tpu.dot_dimension_numbers<[1], [0], [0], [1], [0, 0, 1, 1], [], []>} : vector<128x128xf32>, vector<128x128xf32>, vector<128x128xf32> -> vector<128x128xf32>
    %10 = vector.broadcast %3 : vector<1x128xf32> to vector<128x128xf32>
    %11 = arith.addf %9, %10 : vector<128x128xf32>
    %c0_9 = arith.constant 0 : index
    %c0_10 = arith.constant 0 : index
    %12 = vector.load %arg4[%c0_9, %c0_10] : memref<128x128xf32, #tpu.memory_space<vmem>>, vector<128x128xf32>
    %cst_11 = arith.constant dense<0.000000e+00> : vector<128x128xf32>
    %13 = tpu.matmul %11, %12, %cst_11 {dimension_numbers = #tpu.dot_dimension_numbers<[1], [0], [0], [1], [0, 0, 1, 1], [], []>} : vector<128x128xf32>, vector<128x128xf32>, vector<128x128xf32> -> vector<128x128xf32>
    %cst_12 = arith.constant dense<0.000000e+00> : vector<128x128xf32>
    %14 = tpu.matmul %1, %13, %cst_12 {dimension_numbers = #tpu.dot_dimension_numbers<[1], [0], [0], [1], [0, 0, 1, 1], [], []>} : vector<128x128xf32>, vector<128x128xf32>, vector<128x128xf32> -> vector<128x128xf32>
    %15 = vector.extract_strided_slice %14 {offsets = [0, 0], sizes = [64, 128], strides = [1, 1]} : vector<128x128xf32> to vector<64x128xf32>
    %cst_13 = arith.constant dense<0.000000e+00> : vector<128xf32>
    %16 = vector.multi_reduction <add>, %15, %cst_13 [0] : vector<64x128xf32> to vector<128xf32>
    %17 = vector.shape_cast %16 : vector<128xf32> to vector<1x128xf32>
    %cst_14 = arith.constant 1.562500e-02 : f32
    %18 = vector.broadcast %cst_14 : f32 to vector<1x128xf32>
    %19 = arith.mulf %17, %18 : vector<1x128xf32>
    %20 = vector.broadcast %19 : vector<1x128xf32> to vector<64x128xf32>
    %21 = arith.subf %15, %20 : vector<64x128xf32>
    %22 = arith.mulf %21, %21 : vector<64x128xf32>
    %cst_15 = arith.constant dense<0.000000e+00> : vector<128xf32>
    %23 = vector.multi_reduction <add>, %22, %cst_15 [0] : vector<64x128xf32> to vector<128xf32>
    %24 = vector.shape_cast %23 : vector<128xf32> to vector<1x128xf32>
    %cst_16 = arith.constant 1.562500e-02 : f32
    %25 = vector.broadcast %cst_16 : f32 to vector<1x128xf32>
    %26 = arith.mulf %24, %25 : vector<1x128xf32>
    %cst_17 = arith.constant 9.99999974E-6 : f32
    %27 = vector.broadcast %cst_17 : f32 to vector<1x128xf32>
    %28 = arith.addf %26, %27 : vector<1x128xf32>
    %29 = math.rsqrt %28 : vector<1x128xf32>
    %30 = vector.broadcast %29 : vector<1x128xf32> to vector<64x128xf32>
    %31 = arith.mulf %21, %30 : vector<64x128xf32>
    %32 = vector.broadcast %4 : vector<1x128xf32> to vector<64x128xf32>
    %33 = arith.mulf %32, %31 : vector<64x128xf32>
    %34 = vector.broadcast %5 : vector<1x128xf32> to vector<64x128xf32>
    %35 = arith.addf %33, %34 : vector<64x128xf32>
    %c0_18 = arith.constant 0 : index
    %c0_19 = arith.constant 0 : index
    %c0_20 = arith.constant 0 : index
    %36 = vector.load %arg6[%c0_18, %c0_19, %c0_20] : memref<2x64x128xf32, #tpu.memory_space<vmem>>, vector<1x64x128xf32>
    %37 = vector.shape_cast %36 : vector<1x64x128xf32> to vector<64x128xf32>
    %38 = vector.shape_cast %35 : vector<64x128xf32> to vector<1x64x128xf32>
    tpu.vector_store %arg6[%c0_18, %c0_19, %c0_20], %38 {strides = array<i32>} : memref<2x64x128xf32, #tpu.memory_space<vmem>>, vector<1x64x128xf32>,
    %39 = vector.extract_strided_slice %14 {offsets = [64, 0], sizes = [64, 128], strides = [1, 1]} : vector<128x128xf32> to vector<64x128xf32>
    %cst_21 = arith.constant dense<0.000000e+00> : vector<128xf32>
    %40 = vector.multi_reduction <add>, %39, %cst_21 [0] : vector<64x128xf32> to vector<128xf32>
    %41 = vector.shape_cast %40 : vector<128xf32> to vector<1x128xf32>
    %cst_22 = arith.constant 1.562500e-02 : f32
    %42 = vector.broadcast %cst_22 : f32 to vector<1x128xf32>
    %43 = arith.mulf %41, %42 : vector<1x128xf32>
    %44 = vector.broadcast %43 : vector<1x128xf32> to vector<64x128xf32>
    %45 = arith.subf %39, %44 : vector<64x128xf32>
    %46 = arith.mulf %45, %45 : vector<64x128xf32>
    %cst_23 = arith.constant dense<0.000000e+00> : vector<128xf32>
    %47 = vector.multi_reduction <add>, %46, %cst_23 [0] : vector<64x128xf32> to vector<128xf32>
    %48 = vector.shape_cast %47 : vector<128xf32> to vector<1x128xf32>
    %cst_24 = arith.constant 1.562500e-02 : f32
    %49 = vector.broadcast %cst_24 : f32 to vector<1x128xf32>
    %50 = arith.mulf %48, %49 : vector<1x128xf32>
    %cst_25 = arith.constant 9.99999974E-6 : f32
    %51 = vector.broadcast %cst_25 : f32 to vector<1x128xf32>
    %52 = arith.addf %50, %51 : vector<1x128xf32>
    %53 = math.rsqrt %52 : vector<1x128xf32>
    %54 = vector.broadcast %53 : vector<1x128xf32> to vector<64x128xf32>
    %55 = arith.mulf %45, %54 : vector<64x128xf32>
    %56 = vector.broadcast %4 : vector<1x128xf32> to vector<64x128xf32>
    %57 = arith.mulf %56, %55 : vector<64x128xf32>
    %58 = vector.broadcast %5 : vector<1x128xf32> to vector<64x128xf32>
    %59 = arith.addf %57, %58 : vector<64x128xf32>
    %c1 = arith.constant 1 : index
    %c0_26 = arith.constant 0 : index
    %c0_27 = arith.constant 0 : index
    %60 = vector.load %arg6[%c1, %c0_26, %c0_27] : memref<2x64x128xf32, #tpu.memory_space<vmem>>, vector<1x64x128xf32>
    %61 = vector.shape_cast %60 : vector<1x64x128xf32> to vector<64x128xf32>
    %62 = vector.shape_cast %59 : vector<64x128xf32> to vector<1x64x128xf32>
    tpu.vector_store %arg6[%c1, %c0_26, %c0_27], %62 {strides = array<i32>} : memref<2x64x128xf32, #tpu.memory_space<vmem>>, vector<1x64x128xf32>,
    return
  }
  func.func @transform_0(%arg0: i32) -> (i32, i32, i32) {
    %c0_i32 = arith.constant 0 : i32
    %c0_i32_0 = arith.constant 0 : i32
    %c0_i32_1 = arith.constant 0 : i32
    return %arg0, %c0_i32, %c0_i32_0 : i32, i32, i32
  }
  func.func @transform_1(%arg0: i32) -> (i32, i32) {
    %c0_i32 = arith.constant 0 : i32
    %c0_i32_0 = arith.constant 0 : i32
    %c0_i32_1 = arith.constant 0 : i32
    return %c0_i32, %c0_i32_0 : i32, i32
  }
  func.func @transform_2(%arg0: i32) -> (i32, i32) {
    %c0_i32 = arith.constant 0 : i32
    %c0_i32_0 = arith.constant 0 : i32
    %c0_i32_1 = arith.constant 0 : i32
    return %c0_i32, %c0_i32_0 : i32, i32
  }
  func.func @transform_3(%arg0: i32) -> (i32, i32) {
    %c0_i32 = arith.constant 0 : i32
    %c0_i32_0 = arith.constant 0 : i32
    %c0_i32_1 = arith.constant 0 : i32
    return %c0_i32, %c0_i32_0 : i32, i32
  }
  func.func @transform_4(%arg0: i32) -> (i32, i32) {
    %c0_i32 = arith.constant 0 : i32
    %c0_i32_0 = arith.constant 0 : i32
    %c0_i32_1 = arith.constant 0 : i32
    return %c0_i32, %c0_i32_0 : i32, i32
  }
  func.func @transform_5(%arg0: i32) -> (i32, i32, i32) {
    %c0_i32 = arith.constant 0 : i32
    %c0_i32_0 = arith.constant 0 : i32
    %c0_i32_1 = arith.constant 0 : i32
    return %arg0, %c0_i32, %c0_i32_0 : i32, i32, i32
  }
}

</mosaic_0001>

<bundles_post_ra>
// kernel: forward.1
= control target key start
LH: loop header
LB: loop body
LE: loop exit
PB: predicated region body
PF: predicated region fallthrough
CT: control target
= control target key end

     0   :  { %s1652_s18 = smov 0   ;;  %s2029_s0 = inlined_call_operand.vmem [shape: f32[4,128,128], index: 0, kind: input, shape index: {}]   ;;  %s2030_s1 = inlined_call_operand.vmem [shape: f32[128,128], index: 1, kind: input, shape index: {}]   ;;  %s2031_s2 = inlined_call_operand.vmem [shape: f32[128,128], index: 2, kind: input, shape index: {}]   ;;  %s2032_s3 = inlined_call_operand.vmem [shape: f32[128,128], index: 3, kind: input, shape index: {}]   ;;  %s2033_s4 = inlined_call_operand.vmem [shape: f32[8,128], index: 4, kind: input, shape index: {}]   ;;  %s2034_s5 = inlined_call_operand.vmem [shape: f32[8,64,128], index: 5, kind: output, shape index: {}]  }
   0x1 LB: > { %s1658_s19 = sadd.s32 4294967295, %s1620_s18   ;;  %p1104_p0 = scmp.ge.s32.totalorder %s1620_s18, 1  ;;  %s1620_s18 = sphi %s1652_s18, %s15_s18  }
   0x2   : > { %p187_p1 = scmp.lt.s32.totalorder %s1620_s18, 5 }
   0x4   : > { %p188_p2 = pnand %p1104_p0, %p187_p1 }
   0x5   : > { %v245_v0 = vld [vmem:[%s2030_s1] sm:$0xff] (!%p188_p2)  ;;  %v246_v1 = vld [vmem:[%s2030_s1 + $0x8] sm:$0xff] (!%p188_p2)  ;;  %v247_v2 = vld [vmem:[%s2030_s1 + $0x10] sm:$0xff] (!%p188_p2)  ;;  %p216_p3 = scmp.lt.s32.totalorder (!%p188_p2), %s1658_s19, 3 }
   0x6   : > { %191 = sbr.rel (%p188_p2) target bundleno = 1038 (0x40e), region = 40  ;;  %v1474_v3 = vpack.c.bf16 (!%p188_p2), %v246_v1, %v245_v0  ;;  %v248_v4 = vld [vmem:[%s2030_s1 + $0x18] sm:$0xff] (!%p188_p2)  ;;  %v249_v6 = vld [vmem:[%s2030_s1 + $0x20] sm:$0xff] (!%p188_p2)  ;;  %v250_v7 = vld [vmem:[%s2030_s1 + $0x28] sm:$0xff] (!%p188_p2) }
   0x7   : > { %v1478_v5 = vpack.c.bf16 (!%p188_p2), %v248_v4, %v247_v2  ;;  %v1482_v8 = vpack.c.bf16 (!%p188_p2), %v250_v7, %v249_v6  ;;  %v406_v9 = vld [vmem:[%s2031_s2] sm:$0xff] (!%p188_p2)  ;;  %v407_v10 = vld [vmem:[%s2031_s2 + $0x8] sm:$0xff] (!%p188_p2)  ;;  %v251_v11 = vld [vmem:[%s2030_s1 + $0x30] sm:$0xff] (!%p188_p2) }
   0x8   : > { %1475 = vmatprep.subr.bf16.mxu0 (!%p188_p2), %v1474_v3  ;;  %v252_v12 = vld [vmem:[%s2030_s1 + $0x38] sm:$0xff] (!%p188_p2)  ;;  %v1506_v14 = vpack.c.bf16 (!%p188_p2), %v407_v10, %v406_v9  ;;  %v253_v16 = vld [vmem:[%s2030_s1 + $0x40] sm:$0xff] (!%p188_p2)  ;;  %v254_v17 = vld [vmem:[%s2030_s1 + $0x48] sm:$0xff] (!%p188_p2) }
   0x9   : > { %1477 = vmatpush3.bf16.msra.mxu0 (!%p188_p2), %v1474_v3  ;;  %v1486_v15 = vpack.c.bf16 (!%p188_p2), %v252_v12, %v251_v11  ;;  %v408_v18 = vld [vmem:[%s2031_s2 + $0x10] sm:$0xff] (!%p188_p2)  ;;  %v409_v19 = vld [vmem:[%s2031_s2 + $0x18] sm:$0xff] (!%p188_p2)  ;;  %v410_v21 = vld [vmem:[%s2031_s2 + $0x20] sm:$0xff] (!%p188_p2)  ;;  %v1490_v23 = vpack.c.bf16 (!%p188_p2), %v254_v17, %v253_v16 }
   0xa   : > { %1479 = vmatprep.subr.bf16.mxu0 (!%p188_p2), %v1478_v5  ;;  %1507 = vmatprep.subr.bf16.mxu1 (!%p188_p2), %v1506_v14  ;;  %v1510_v20 = vpack.c.bf16 (!%p188_p2), %v409_v19, %v408_v18  ;;  %v411_v22 = vld [vmem:[%s2031_s2 + $0x28] sm:$0xff] (!%p188_p2)  ;;  %v412_v25 = vld [vmem:[%s2031_s2 + $0x30] sm:$0xff] (!%p188_p2)  ;;  %v413_v26 = vld [vmem:[%s2031_s2 + $0x38] sm:$0xff] (!%p188_p2) }
   0xb   : > { %1509 = vmatpush3.bf16.msra.mxu1 (!%p188_p2), %v1506_v14  ;;  %v1514_v24 = vpack.c.bf16 (!%p188_p2), %v411_v22, %v410_v21  ;;  %v255_v27 = vld [vmem:[%s2030_s1 + $0x50] sm:$0xff] (!%p188_p2)  ;;  %v256_v28 = vld [vmem:[%s2030_s1 + $0x58] sm:$0xff] (!%p188_p2)  ;;  %v1518_v29 = vpack.c.bf16 (!%p188_p2), %v413_v26, %v412_v25  ;;  %v414_v31 = vld [vmem:[%s2031_s2 + $0x40] sm:$0xff] (!%p188_p2) }
   0xc   : > { %1511 = vmatprep.subr.bf16.mxu1 (!%p188_p2), %v1510_v20  ;;  %v1494_v30 = vpack.c.bf16 (!%p188_p2), %v256_v28, %v255_v27  ;;  %v415_v32 = vld [vmem:[%s2031_s2 + $0x48] sm:$0xff] (!%p188_p2)  ;;  %v257_v33 = vld [vmem:[%s2030_s1 + $0x60] sm:$0xff] (!%p188_p2)  ;;  %v416_v37 = vld [vmem:[%s2031_s2 + $0x50] sm:$0xff] (!%p188_p2) }
   0xd   : > { %s217_s7 = scalar_select %p216_p3, %s1658_s19, 3  ;;  %1481 = vmatpush3.bf16.msra.mxu0 %v1478_v5  ;;  %v258_v34 = vld [vmem:[%s2030_s1 + $0x68] sm:$0xff]  ;;  %v1522_v35 = vpack.c.bf16 %v415_v32, %v414_v31  ;;  %v417_v38 = vld [vmem:[%s2031_s2 + $0x58] sm:$0xff]  ;;  %v259_v39 = vld [vmem:[%s2030_s1 + $0x70] sm:$0xff] }
   0xe   : > { %1483 = vmatprep.subr.bf16.mxu0 %v1482_v8  ;;  %v1498_v36 = vpack.c.bf16 %v258_v34, %v257_v33  ;;  %v260_v40 = vld [vmem:[%s2030_s1 + $0x78] sm:$0xff]  ;;  %v1526_v41 = vpack.c.bf16 %v417_v38, %v416_v37  ;;  %v418_v43 = vld [vmem:[%s2031_s2 + $0x60] sm:$0xff]  ;;  %v419_v44 = vld [vmem:[%s2031_s2 + $0x68] sm:$0xff] }
   0xf   : > { %s1120_s8 = sshll.u32 %s217_s7, 7  ;;  %1513 = vmatpush3.bf16.msra.mxu1 %v1510_v20  ;;  %v1502_v42 = vpack.c.bf16 %v260_v40, %v259_v39  ;;  %v1530_v45 = vpack.c.bf16 %v419_v44, %v418_v43  ;;  %v420_v46 = vld [vmem:[%s2031_s2 + $0x70] sm:$0xff]  ;;  %v421_v47 = vld [vmem:[%s2031_s2 + $0x78] sm:$0xff]  ;;  %v571_v0 = vld [vmem:[%s2032_s3] sm:$0xff]  ;;  %s1107_s7 = sshll.u32 %s1658_s19, 1 }
  0x10   : > { %s1685_s11 = scalar_lea.vmem %s2029_s0, %s1120_s8  ;;  %1515 = vmatprep.subr.bf16.mxu1 %v1514_v24  ;;  %v1534_v49 = vpack.c.bf16 %v421_v47, %v420_v46  ;;  %v572_v1 = vld [vmem:[%s2032_s3 + $0x8] sm:$0xff]  ;;  %v573_v2 = vld [vmem:[%s2032_s3 + $0x10] sm:$0xff]  ;;  %v574_v4 = vld [vmem:[%s2032_s3 + $0x18] sm:$0xff]  ;;  %p222_p4 = scmp.lt.s32.totalorder %s1107_s7, 7 }
  0x11   : > { %v1700_v13 = vld [vmem:[%s1685_s11] sm:$0xff]  ;;  %1485 = vmatpush3.bf16.msra.mxu0 %v1482_v8  ;;  %v1770_v48 = vld [vmem:[%s1685_s11 + $0x8] sm:$0xff]  ;;  %v1773_v50 = vld [vmem:[%s1685_s11 + $0x10] sm:$0xff]  ;;  %v1538_v3 = vpack.c.bf16 %v572_v1, %v571_v0  ;;  %v1542_v5 = vpack.c.bf16 %v574_v4, %v573_v2 }
  0x12   : > { %1282 = vmatprep.mubr.f32.mxu0 %v1700_v13  ;;  %1487 = vmatprep.subr.bf16.mxu0 %v1486_v15  ;;  %v1778_v51 = vld [vmem:[%s1685_s11 + $0x18] sm:$0xff]  ;;  %v1781_v52 = vld [vmem:[%s1685_s11 + $0x20] sm:$0xff]  ;;  %v1786_v53 = vld [vmem:[%s1685_s11 + $0x28] sm:$0xff]  ;;  %s2036_s7 = smov (!%p222_p4, %s1107_s7), 7 }
  0x13   : > { %1517 = vmatpush3.bf16.msra.mxu1 %v1514_v24  ;;  %v1789_v54 = vld [vmem:[%s1685_s11 + $0x30] sm:$0xff]  ;;  %v1794_v55 = vld [vmem:[%s1685_s11 + $0x38] sm:$0xff]  ;;  %v1797_v56 = vld [vmem:[%s1685_s11 + $0x40] sm:$0xff]  ;;  %s1121_s19 = sshll.u32 %s2036_s7, 6 }
  0x14   : > { %1519 = vmatprep.subr.bf16.mxu1 %v1518_v29  ;;  %v1802_v57 = vld [vmem:[%s1685_s11 + $0x48] sm:$0xff]  ;;  %v1805_v58 = vld [vmem:[%s1685_s11 + $0x50] sm:$0xff]  ;;  %v1810_v59 = vld [vmem:[%s1685_s11 + $0x58] sm:$0xff]  ;;  %s1984_s10 = scalar_lea.vmem %s2034_s5, %s1121_s19 }
  0x15   : > { %1489 = vmatpush3.bf16.msra.mxu0 %v1486_v15  ;;  %v1813_v60 = vld [vmem:[%s1685_s11 + $0x60] sm:$0xff]  ;;  %v1818_v61 = vld [vmem:[%s1685_s11 + $0x68] sm:$0xff]  ;;  %v1821_v62 = vld [vmem:[%s1685_s11 + $0x70] sm:$0xff] }
  0x16   : > { %1491 = vmatprep.subr.bf16.mxu0 %v1490_v23  ;;  %v1826_v63 = vld [vmem:[%s1685_s11 + $0x78] sm:$0xff]  ;;  %v575_v6 = vld [vmem:[%s2032_s3 + $0x20] sm:$0xff]  ;;  %v576_v7 = vld [vmem:[%s2032_s3 + $0x28] sm:$0xff] }
  0x17   : > { %1521 = vmatpush3.bf16.msra.mxu1 %v1518_v29  ;;  %v1546_v8 = vpack.c.bf16 %v576_v7, %v575_v6  ;;  %v577_v9 = vld [vmem:[%s2032_s3 + $0x30] sm:$0xff]  ;;  %v578_v10 = vld [vmem:[%s2032_s3 + $0x38] sm:$0xff]  ;;  %v579_v12 = vld [vmem:[%s2032_s3 + $0x40] sm:$0xff] }
  0x18   : > { %1523 = vmatprep.subr.bf16.mxu1 %v1522_v35  ;;  %v1550_v11 = vpack.c.bf16 %v578_v10, %v577_v9  ;;  %v580_v14 = vld [vmem:[%s2032_s3 + $0x48] sm:$0xff]  ;;  %v581_v16 = vld [vmem:[%s2032_s3 + $0x50] sm:$0xff]  ;;  %v582_v17 = vld [vmem:[%s2032_s3 + $0x58] sm:$0xff] }
  0x19   : > { %1493 = vmatpush3.bf16.msra.mxu0 %v1490_v23  ;;  %v1554_v15 = vpack.c.bf16 %v580_v14, %v579_v12  ;;  %v1558_v18 = vpack.c.bf16 %v582_v17, %v581_v16  ;;  %v583_v19 = vld [vmem:[%s2032_s3 + $0x60] sm:$0xff]  ;;  %v584_v20 = vld [vmem:[%s2032_s3 + $0x68] sm:$0xff]  ;;  %v585_v38 = vld [vmem:[%s2032_s3 + $0x70] sm:$0xff] }
  0x1a   : > { %1495 = vmatprep.subr.bf16.mxu0 %v1494_v30  ;;  %v1562_v21 = vpack.c.bf16 %v584_v20, %v583_v19  ;;  %v586_v39 = vld [vmem:[%s2032_s3 + $0x78] sm:$0xff] }
  0x1b   : > { %1525 = vmatpush3.bf16.msra.mxu1 %v1522_v35  ;;  %v1566_v40 = vpack.c.bf16 %v586_v39, %v585_v38 }
  0x1c   : > { %1527 = vmatprep.subr.bf16.mxu1 %v1526_v41 }
  0x1d   : > { %1497 = vmatpush3.bf16.msra.mxu0 %v1494_v30 }
  0x1e   : > { %1499 = vmatprep.subr.bf16.mxu0 %v1498_v36 }
  0x1f   : > { %1529 = vmatpush3.bf16.msra.mxu1 %v1526_v41  ;;  %v422_v41 = vlaneseq }
  0x20   : > { %1531 = vmatprep.subr.bf16.mxu1 %v1530_v45 }
  0x21   : > { %1501 = vmatpush3.bf16.msra.mxu0 %v1498_v36 }
  0x22   : > { %1503 = vmatprep.subr.bf16.mxu0 %v1502_v42 }
  0x23   : > { %1533 = vmatpush3.bf16.msra.mxu1 %v1530_v45 }
  0x24   : > { %1535 = vmatprep.subr.bf16.mxu1 %v1534_v49 }
  0x25   : > { %1505 = vmatpush3.bf16.msra.mxu0 %v1502_v42  ;;  %v1878_v42 = vshrl.u32 %v422_v41, 7 }
  0x26   : > { %1539 = vmatprep.subr.bf16.mxu0 %v1538_v3 }
  0x27   : > { %1537 = vmatpush3.bf16.msra.mxu1 %v1534_v49  ;;  %v424_v43 = vsub.s32 0, %v1878_v42 }
  0x28   : > { %1283 = vmatmul.mubr.f32.vlgmr.msra.gmra.mrb[0].mxu0 %v1770_v48 }
  0x29   : > { %1285 = vmatprep.mubr.f32.mxu0 %v1773_v50  ;;  %1541 = vmatpush3.bf16.msra.mxu0 %v1538_v3 }
  0x2a   : > { %1543 = vmatprep.subr.bf16.mxu0 %v1542_v5 }
  0x2c   : > { %1286 = vmatmul.mubr.f32.gmra.mrb[2].mxu0 %v1778_v51 }
  0x2d   : > { %1288 = vmatprep.mubr.f32.mxu0 %v1781_v52  ;;  %1545 = vmatpush3.bf16.msra.mxu0 %v1542_v5 }
  0x2e   : > { %1547 = vmatprep.subr.bf16.mxu0 %v1546_v8 }
  0x30   : > { %1289 = vmatmul.mubr.f32.gmra.mrb[4].mxu0 %v1786_v53 }
  0x31   : > { %1291 = vmatprep.mubr.f32.mxu0 %v1789_v54  ;;  %1549 = vmatpush3.bf16.msra.mxu0 %v1546_v8 }
  0x32   : > { %1551 = vmatprep.subr.bf16.mxu0 %v1550_v11 }
  0x34   : > { %1292 = vmatmul.mubr.f32.gmra.mrb[6].mxu0 %v1794_v55 }
  0x35   : > { %1294 = vmatprep.mubr.f32.mxu0 %v1797_v56  ;;  %1553 = vmatpush3.bf16.msra.mxu0 %v1550_v11 }
  0x36   : > { %1555 = vmatprep.subr.bf16.mxu0 %v1554_v15 }
  0x38   : > { %1295 = vmatmul.mubr.f32.gmra.mrb[8].mxu0 %v1802_v57 }
  0x39   : > { %1297 = vmatprep.mubr.f32.mxu0 %v1805_v58  ;;  %1557 = vmatpush3.bf16.msra.mxu0 %v1554_v15 }
  0x3a   : > { %1559 = vmatprep.subr.bf16.mxu0 %v1558_v18 }
  0x3c   : > { %1298 = vmatmul.mubr.f32.gmra.mrb[10].mxu0 %v1810_v59 }
  0x3d   : > { %1300 = vmatprep.mubr.f32.mxu0 %v1813_v60  ;;  %1561 = vmatpush3.bf16.msra.mxu0 %v1558_v18 }
  0x3e   : > { %1563 = vmatprep.subr.bf16.mxu0 %v1562_v21 }
  0x40   : > { %1301 = vmatmul.mubr.f32.gmra.mrb[12].mxu0 %v1818_v61 }
  0x41   : > { %1303 = vmatprep.mubr.f32.mxu0 %v1821_v62  ;;  %1565 = vmatpush3.bf16.msra.mxu0 %v1562_v21 }
  0x42   : > { %1567 = vmatprep.subr.bf16.mxu0 %v1566_v40 }
  0x44   : > { %1304 = vmatmul.mubr.f32.gmra.mrb[14].mxu0 %v1826_v63 }
  0x45   : > { %1569 = vmatpush3.bf16.msra.mxu0 %v1566_v40 }
  0xfb   : > { %v1284_v22 = vpop.f32.mrb[0].mxu0 }
  0xfc   : > { %v327_v23 = vpop.f32.mrb[1].mxu0 }
  0xfd   : > { %1338 = vmatprep.mubr.f32.mxu1 %v327_v23 }
  0xfe   : > { %1339 = vmatmul.mubr.f32.vlgmr.msra.gmra.mrb[0].mxu1 %v1284_v22 }
  0xff   : > { %v1287_v24 = vpop.f32.mrb[2].mxu0 }
 0x100   : > { %v337_v25 = vpop.f32.mrb[3].mxu0 }
 0x101   : > { %1341 = vmatprep.mubr.f32.mxu1 %v337_v25 }
 0x102   : > { %1342 = vmatmul.mubr.f32.gmra.mrb[2].mxu1 %v1287_v24 }
 0x103   : > { %v1290_v26 = vpop.f32.mrb[4].mxu0 }
 0x104   : > { %v347_v27 = vpop.f32.mrb[5].mxu0 }
 0x105   : > { %1344 = vmatprep.mubr.f32.mxu1 %v347_v27 }
 0x106   : > { %1345 = vmatmul.mubr.f32.gmra.mrb[4].mxu1 %v1290_v26 }
 0x107   : > { %v1293_v28 = vpop.f32.mrb[6].mxu0 }
 0x108   : > { %v357_v29 = vpop.f32.mrb[7].mxu0 }
 0x109   : > { %1347 = vmatprep.mubr.f32.mxu1 %v357_v29 }
 0x10a   : > { %1348 = vmatmul.mubr.f32.gmra.mrb[6].mxu1 %v1293_v28 }
 0x10b   : > { %v1296_v30 = vpop.f32.mrb[8].mxu0 }
 0x10c   : > { %v367_v31 = vpop.f32.mrb[9].mxu0 }
 0x10d   : > { %1350 = vmatprep.mubr.f32.mxu1 %v367_v31 }
 0x10e   : > { %1351 = vmatmul.mubr.f32.gmra.mrb[8].mxu1 %v1296_v30 }
 0x10f   : > { %v1299_v32 = vpop.f32.mrb[10].mxu0 }
 0x110   : > { %v377_v33 = vpop.f32.mrb[11].mxu0 }
 0x111   : > { %1353 = vmatprep.mubr.f32.mxu1 %v377_v33 }
 0x112   : > { %1354 = vmatmul.mubr.f32.gmra.mrb[10].mxu1 %v1299_v32 }
 0x113   : > { %v1302_v34 = vpop.f32.mrb[12].mxu0 }
 0x114   : > { %v387_v35 = vpop.f32.mrb[13].mxu0 }
 0x115   : > { %1356 = vmatprep.mubr.f32.mxu1 %v387_v35 }
 0x116   : > { %1357 = vmatmul.mubr.f32.gmra.mrb[12].mxu1 %v1302_v34 }
 0x117   : > { %v1305_v36 = vpop.f32.mrb[14].mxu0 }
 0x118   : > { %v397_v37 = vpop.f32.mrb[15].mxu0 }
 0x119   : > { %1359 = vmatprep.mubr.f32.mxu1 %v397_v37 }
 0x11a   : > { %1360 = vmatmul.mubr.f32.gmra.mrb[14].mxu1 %v1305_v36 }
 0x11b   : > { %1450 = vmatprep.mubr.f32.mxu1 %v1700_v13  ;;  %v1884_v13 = vld [vmem:[%s2033_s4] sm:$0xff] }
 0x11c   : > { %v425_v44 = vrot.slane %v1884_v13, %v424_v43 }
 0x1d1   : > { %v1340_v45 = vpop.f32.mrb[0].mxu1 }
 0x1d2   : > { %v492_v46 = vpop.f32.mrb[1].mxu1  ;;  %v498_v49 = vadd.f32 %v1340_v45, %v425_v44 }
 0x1d3   : > { %v493_v47 = vadd.f32 %v492_v46, %v425_v44 }
 0x1d5   : > { %v1343_v0 = vpop.f32.mrb[2].mxu1  ;;  %1394 = vmatprep.mubr.f32.mxu0 %v493_v47 }
 0x1d6   : > { %v502_v1 = vpop.f32.mrb[3].mxu1  ;;  %1395 = vmatmul.mubr.f32.vlgmr.msra.gmra.mrb[16].mxu0 %v498_v49  ;;  %v508_v3 = vadd.f32 %v1343_v0, %v425_v44 }
 0x1d7   : > { %v503_v2 = vadd.f32 %v502_v1, %v425_v44 }
 0x1d9   : > { %v1346_v4 = vpop.f32.mrb[4].mxu1  ;;  %1397 = vmatprep.mubr.f32.mxu0 %v503_v2 }
 0x1da   : > { %v512_v5 = vpop.f32.mrb[5].mxu1  ;;  %1398 = vmatmul.mubr.f32.gmra.mrb[18].mxu0 %v508_v3  ;;  %v518_v7 = vadd.f32 %v1346_v4, %v425_v44 }
 0x1db   : > { %v513_v6 = vadd.f32 %v512_v5, %v425_v44 }
 0x1dd   : > { %v1349_v8 = vpop.f32.mrb[6].mxu1  ;;  %1400 = vmatprep.mubr.f32.mxu0 %v513_v6 }
 0x1de   : > { %v522_v9 = vpop.f32.mrb[7].mxu1  ;;  %1401 = vmatmul.mubr.f32.gmra.mrb[20].mxu0 %v518_v7  ;;  %v528_v11 = vadd.f32 %v1349_v8, %v425_v44 }
 0x1df   : > { %v523_v10 = vadd.f32 %v522_v9, %v425_v44 }
 0x1e1   : > { %v1352_v12 = vpop.f32.mrb[8].mxu1  ;;  %1403 = vmatprep.mubr.f32.mxu0 %v523_v10 }
 0x1e2   : > { %v532_v14 = vpop.f32.mrb[9].mxu1  ;;  %1404 = vmatmul.mubr.f32.gmra.mrb[22].mxu0 %v528_v11  ;;  %v538_v16 = vadd.f32 %v1352_v12, %v425_v44 }
 0x1e3   : > { %v533_v15 = vadd.f32 %v532_v14, %v425_v44 }
 0x1e5   : > { %v1355_v17 = vpop.f32.mrb[10].mxu1  ;;  %1406 = vmatprep.mubr.f32.mxu0 %v533_v15 }
 0x1e6   : > { %v542_v18 = vpop.f32.mrb[11].mxu1  ;;  %1407 = vmatmul.mubr.f32.gmra.mrb[24].mxu0 %v538_v16  ;;  %v548_v20 = vadd.f32 %v1355_v17, %v425_v44 }
 0x1e7   : > { %v543_v19 = vadd.f32 %v542_v18, %v425_v44 }
 0x1e9   : > { %v1358_v21 = vpop.f32.mrb[12].mxu1  ;;  %1409 = vmatprep.mubr.f32.mxu0 %v543_v19 }
 0x1ea   : > { %v552_v22 = vpop.f32.mrb[13].mxu1  ;;  %1410 = vmatmul.mubr.f32.gmra.mrb[26].mxu0 %v548_v20  ;;  %v558_v24 = vadd.f32 %v1358_v21, %v425_v44 }
 0x1eb   : > { %v553_v23 = vadd.f32 %v552_v22, %v425_v44 }
 0x1ed   : > { %v1361_v25 = vpop.f32.mrb[14].mxu1  ;;  %1412 = vmatprep.mubr.f32.mxu0 %v553_v23 }
 0x1ee   : > { %v562_v26 = vpop.f32.mrb[15].mxu1  ;;  %1413 = vmatmul.mubr.f32.gmra.mrb[28].mxu0 %v558_v24  ;;  %v568_v28 = vadd.f32 %v1361_v25, %v425_v44 }
 0x1ef   : > { %v563_v27 = vadd.f32 %v562_v26, %v425_v44 }
 0x1f1   : > { %1415 = vmatprep.mubr.f32.mxu0 %v563_v27 }
 0x1f2   : > { %1416 = vmatmul.mubr.f32.gmra.mrb[30].mxu0 %v568_v28 }
 0x2a9   : > { %v1396_v29 = vpop.f32.mrb[16].mxu0 }
 0x2aa   : > { %v653_v30 = vpop.f32.mrb[17].mxu0 }
 0x2ab   : > { %v1570_v31 = vpack.c.bf16 %v1396_v29, %v653_v30 }
 0x2ad   : > { %v1399_v32 = vpop.f32.mrb[18].mxu0  ;;  %1571 = vmatprep.subr.bf16.mxu1 %v1570_v31 }
 0x2ae   : > { %v663_v33 = vpop.f32.mrb[19].mxu0  ;;  %1573 = vmatpush3.bf16.msra.mxu1 %v1570_v31 }
 0x2af   : > { %v1574_v34 = vpack.c.bf16 %v1399_v32, %v663_v33 }
 0x2b1   : > { %v1402_v35 = vpop.f32.mrb[20].mxu0  ;;  %1575 = vmatprep.subr.bf16.mxu1 %v1574_v34 }
 0x2b2   : > { %v673_v36 = vpop.f32.mrb[21].mxu0  ;;  %1577 = vmatpush3.bf16.msra.mxu1 %v1574_v34 }
 0x2b3   : > { %v1578_v37 = vpack.c.bf16 %v1402_v35, %v673_v36 }
 0x2b5   : > { %v1405_v38 = vpop.f32.mrb[22].mxu0  ;;  %1579 = vmatprep.subr.bf16.mxu1 %v1578_v37 }
 0x2b6   : > { %v683_v39 = vpop.f32.mrb[23].mxu0  ;;  %1581 = vmatpush3.bf16.msra.mxu1 %v1578_v37 }
 0x2b7   : > { %v1582_v40 = vpack.c.bf16 %v1405_v38, %v683_v39 }
 0x2b9   : > { %v1408_v41 = vpop.f32.mrb[24].mxu0  ;;  %1583 = vmatprep.subr.bf16.mxu1 %v1582_v40 }
 0x2ba   : > { %v693_v43 = vpop.f32.mrb[25].mxu0  ;;  %1585 = vmatpush3.bf16.msra.mxu1 %v1582_v40 }
 0x2bb   : > { %v1586_v44 = vpack.c.bf16 %v1408_v41, %v693_v43 }
 0x2bd   : > { %v1411_v45 = vpop.f32.mrb[26].mxu0  ;;  %1587 = vmatprep.subr.bf16.mxu1 %v1586_v44 }
 0x2be   : > { %v703_v46 = vpop.f32.mrb[27].mxu0  ;;  %1589 = vmatpush3.bf16.msra.mxu1 %v1586_v44 }
 0x2bf   : > { %v1590_v47 = vpack.c.bf16 %v1411_v45, %v703_v46 }
 0x2c1   : > { %v1414_v49 = vpop.f32.mrb[28].mxu0  ;;  %1591 = vmatprep.subr.bf16.mxu1 %v1590_v47 }
 0x2c2   : > { %v713_v0 = vpop.f32.mrb[29].mxu0  ;;  %1593 = vmatpush3.bf16.msra.mxu1 %v1590_v47 }
 0x2c3   : > { %v1594_v1 = vpack.c.bf16 %v1414_v49, %v713_v0 }
 0x2c5   : > { %v1417_v2 = vpop.f32.mrb[30].mxu0  ;;  %1595 = vmatprep.subr.bf16.mxu1 %v1594_v1 }
 0x2c6   : > { %v723_v3 = vpop.f32.mrb[31].mxu0  ;;  %1597 = vmatpush3.bf16.msra.mxu1 %v1594_v1 }
 0x2c7   : > { %v1598_v4 = vpack.c.bf16 %v1417_v2, %v723_v3 }
 0x2c9   : > { %1599 = vmatprep.subr.bf16.mxu1 %v1598_v4 }
 0x2ca   : > { %1601 = vmatpush3.bf16.msra.mxu1 %v1598_v4 }
 0x2cd   : > { %1451 = vmatmul.mubr.f32.vlgmr.msra.gmra.mrb[16].mxu1 %v1770_v48 }
 0x2ce   : > { %1453 = vmatprep.mubr.f32.mxu1 %v1773_v50 }
 0x2d1   : > { %1454 = vmatmul.mubr.f32.gmra.mrb[18].mxu1 %v1778_v51 }
 0x2d2   : > { %1456 = vmatprep.mubr.f32.mxu1 %v1781_v52 }
 0x2d5   : > { %1457 = vmatmul.mubr.f32.gmra.mrb[20].mxu1 %v1786_v53 }
 0x2d6   : > { %1459 = vmatprep.mubr.f32.mxu1 %v1789_v54 }
 0x2d9   : > { %1460 = vmatmul.mubr.f32.gmra.mrb[22].mxu1 %v1794_v55 }
 0x2da   : > { %1462 = vmatprep.mubr.f32.mxu1 %v1797_v56 }
 0x2dd   : > { %1463 = vmatmul.mubr.f32.gmra.mrb[24].mxu1 %v1802_v57 }
 0x2de   : > { %1465 = vmatprep.mubr.f32.mxu1 %v1805_v58 }
 0x2e1   : > { %1466 = vmatmul.mubr.f32.gmra.mrb[26].mxu1 %v1810_v59 }
 0x2e2   : > { %1468 = vmatprep.mubr.f32.mxu1 %v1813_v60 }
 0x2e5   : > { %1469 = vmatmul.mubr.f32.gmra.mrb[28].mxu1 %v1818_v61 }
 0x2e6   : > { %1471 = vmatprep.mubr.f32.mxu1 %v1821_v62 }
 0x2e9   : > { %1472 = vmatmul.mubr.f32.gmra.mrb[30].mxu1 %v1826_v63 }
 0x3a0   : > { %v1452_v48 = vpop.f32.mrb[16].mxu1 }
 0x3a1   : > { %v798_v50 = vpop.f32.mrb[17].mxu1 }
 0x3a2   : > { %v877_v51 = vadd.f32 %v1452_v48, %v798_v50 }
 0x3a4   : > { %v1455_v52 = vpop.f32.mrb[18].mxu1 }
 0x3a5   : > { %v808_v53 = vpop.f32.mrb[19].mxu1 }
 0x3a6   : > { %v878_v54 = vadd.f32 %v877_v51, %v808_v53 }
 0x3a8   : > { %v1458_v55 = vpop.f32.mrb[20].mxu1  ;;  %v879_v56 = vadd.f32 %v1455_v52, %v878_v54 }
 0x3a9   : > { %v818_v57 = vpop.f32.mrb[21].mxu1 }
 0x3aa   : > { %v880_v58 = vadd.f32 %v879_v56, %v818_v57 }
 0x3ac   : > { %v1461_v5 = vpop.f32.mrb[22].mxu1  ;;  %v881_v59 = vadd.f32 %v1458_v55, %v880_v58 }
 0x3ad   : > { %v828_v6 = vpop.f32.mrb[23].mxu1 }
 0x3ae   : > { %v882_v60 = vadd.f32 %v881_v59, %v828_v6 }
 0x3b0   : > { %v883_v7 = vadd.f32 %v1461_v5, %v882_v60  ;;  %v1464_v61 = vpop.f32.mrb[24].mxu1 }
 0x3b1   : > { %v838_v8 = vpop.f32.mrb[25].mxu1 }
 0x3b2   : > { %v884_v62 = vrot.slane %v883_v7, 4  ;;  %v963_v9 = vadd.f32 %v1464_v61, %v838_v8 }
 0x3b4   : > { %v885_v63 = vadd.f32 %v884_v62, %v883_v7  ;;  %v1467_v10 = vpop.f32.mrb[26].mxu1 }
 0x3b5   : > { %v848_v11 = vpop.f32.mrb[27].mxu1 }
 0x3b6   : > { %v886_v12 = vrot.slane %v885_v63, 2  ;;  %v964_v14 = vadd.f32 %v963_v9, %v848_v11 }
 0x3b8   : > { %v887_v15 = vadd.f32 %v886_v12, %v885_v63  ;;  %v1470_v16 = vpop.f32.mrb[28].mxu1  ;;  %v965_v17 = vadd.f32 %v1467_v10, %v964_v14 }
 0x3b9   : > { %v858_v18 = vpop.f32.mrb[29].mxu1 }
 0x3ba   : > { %v888_v19 = vrot.slane %v887_v15, 1  ;;  %v966_v20 = vadd.f32 %v965_v17, %v858_v18 }
 0x3bc   : > { %v889_v21 = vadd.f32 %v888_v19, %v887_v15  ;;  %v1473_v22 = vpop.f32.mrb[30].mxu1  ;;  %v967_v23 = vadd.f32 %v1470_v16, %v966_v20 }
 0x3bd   : > { %v868_v24 = vpop.f32.mrb[31].mxu1 }
 0x3be   : > { %v890_v25 = vmul.f32 0.015625, %v889_v21  ;;  %v968_v26 = vadd.f32 %v967_v23, %v868_v24 }
 0x3c0   : > { %v1902_v27 = vsub.f32 %v798_v50, %v890_v25  ;;  %v1904_v28 = vsub.f32 %v1452_v48, %v890_v25  ;;  %v1906_v29 = vsub.f32 %v808_v53, %v890_v25  ;;  %v1908_v30 = vsub.f32 %v1455_v52, %v890_v25 }
 0x3c1   : > { %v1910_v31 = vsub.f32 %v818_v57, %v890_v25  ;;  %v1912_v32 = vsub.f32 %v1458_v55, %v890_v25  ;;  %v1914_v33 = vsub.f32 %v828_v6, %v890_v25  ;;  %v1916_v34 = vsub.f32 %v1461_v5, %v890_v25 }
 0x3c2   : > { %v899_v35 = vmul.f32 %v1902_v27, %v1902_v27  ;;  %v900_v36 = vmul.f32 %v1904_v28, %v1904_v28  ;;  %v901_v37 = vmul.f32 %v1906_v29, %v1906_v29  ;;  %v969_v39 = vadd.f32 %v1473_v22, %v968_v26 }
 0x3c3   : > { %v902_v40 = vmul.f32 %v1908_v30, %v1908_v30  ;;  %v903_v44 = vmul.f32 %v1910_v31, %v1910_v31  ;;  %v904_v47 = vmul.f32 %v1912_v32, %v1912_v32  ;;  %v905_v1 = vmul.f32 %v1914_v33, %v1914_v33 }
 0x3c4   : > { %v907_v38 = vadd.f32 %v900_v36, %v899_v35  ;;  %v970_v43 = vrot.slane %v969_v39, 4  ;;  %v906_v4 = vmul.f32 %v1916_v34, %v1916_v34  ;;  %v933_v36 = vsub.s32 1, %v1878_v42 }
 0x3c6   : > { %v908_v41 = vadd.f32 %v907_v38, %v901_v37  ;;  %v971_v46 = vadd.f32 %v970_v43, %v969_v39  ;;  %v945_v37 = vsub.s32 2, %v1878_v42 }
 0x3c8   : > { %v909_v45 = vadd.f32 %v908_v41, %v902_v40  ;;  %v972_v0 = vrot.slane %v971_v46, 2  ;;  %v934_v40 = vrot.slane %v1884_v13, %v933_v36  ;;  %v1971_v43 = vrot.slane %v1884_v13, %v945_v37 }
 0x3ca   : > { %v910_v49 = vadd.f32 %v909_v45, %v903_v44  ;;  %v973_v3 = vadd.f32 %v972_v0, %v971_v46 }
 0x3cc   : > { %v911_v2 = vadd.f32 %v910_v49, %v904_v47  ;;  %v974_v50 = vrot.slane %v973_v3, 1 }
 0x3ce   : > { %v912_v48 = vadd.f32 %v911_v2, %v905_v1  ;;  %v975_v52 = vadd.f32 %v974_v50, %v973_v3 }
 0x3d0   : > { %v913_v51 = vadd.f32 %v912_v48, %v906_v4  ;;  %v976_v54 = vmul.f32 0.015625, %v975_v52 }
 0x3d2   : > { %v914_v53 = vrot.slane %v913_v51, 4  ;;  %v1934_v56 = vsub.f32 %v838_v8, %v976_v54  ;;  %v1936_v57 = vsub.f32 %v1464_v61, %v976_v54  ;;  %v1938_v58 = vsub.f32 %v848_v11, %v976_v54 }
 0x3d3   : > { %v1940_v5 = vsub.f32 %v1467_v10, %v976_v54  ;;  %v1942_v59 = vsub.f32 %v858_v18, %v976_v54  ;;  %v1944_v6 = vsub.f32 %v1470_v16, %v976_v54  ;;  %v1946_v60 = vsub.f32 %v868_v24, %v976_v54 }
 0x3d4   : > { %v915_v55 = vadd.f32 %v914_v53, %v913_v51  ;;  %v1948_v62 = vsub.f32 %v1473_v22, %v976_v54  ;;  %v985_v9 = vmul.f32 %v1934_v56, %v1934_v56  ;;  %v986_v61 = vmul.f32 %v1936_v57, %v1936_v57 }
 0x3d5   : > { %v987_v63 = vmul.f32 %v1938_v58, %v1938_v58  ;;  %v988_v12 = vmul.f32 %v1940_v5, %v1940_v5  ;;  %v989_v16 = vmul.f32 %v1942_v59, %v1942_v59  ;;  %v990_v19 = vmul.f32 %v1944_v6, %v1944_v6 }
 0x3d6   : > { %v916_v7 = vrot.slane %v915_v55, 2  ;;  %v993_v10 = vadd.f32 %v986_v61, %v985_v9  ;;  %v991_v22 = vmul.f32 %v1946_v60, %v1946_v60  ;;  %v992_v24 = vmul.f32 %v1948_v62, %v1948_v62 }
 0x3d8   : > { %v917_v8 = vadd.f32 %v916_v7, %v915_v55  ;;  %v994_v14 = vadd.f32 %v993_v10, %v987_v63 }
 0x3da   : > { %v918_v11 = vrot.slane %v917_v8, 1  ;;  %v995_v17 = vadd.f32 %v994_v14, %v988_v12 }
 0x3dc   : > { %v919_v15 = vadd.f32 %v918_v11, %v917_v8  ;;  %v996_v20 = vadd.f32 %v995_v17, %v989_v16 }
 0x3de   : > { %v920_v18 = vmul.f32 0.015625, %v919_v15  ;;  %v997_v23 = vadd.f32 %v996_v20, %v990_v19 }
 0x3e0   : > { %v921_v21 = vadd.f32 1e-05, %v920_v18  ;;  %v998_v25 = vadd.f32 %v997_v23, %v991_v22 }
 0x3e2   : > { %1610 = vrsqrt.f32 %v921_v21  ;;  %v999_v26 = vadd.f32 %v998_v25, %v992_v24 }
 0x3e4   : > { %v1000_v35 = vrot.slane %v999_v26, 4 }
 0x3e6   : > { %v1001_v38 = vadd.f32 %v1000_v35, %v999_v26 }
 0x3e8   : > { %v1002_v39 = vrot.slane %v1001_v38, 2 }
 0x3ea   : > { %v1003_v44 = vadd.f32 %v1002_v39, %v1001_v38 }
 0x3ec   : > { %v1611_v41 = vpop.eup %1610  ;;  %v1004_v54 = vrot.slane %v1003_v44, 1 }
 0x3ed   : > { %v923_v45 = vmul.f32 %v1611_v41, %v1902_v27  ;;  %v924_v46 = vmul.f32 %v1611_v41, %v1904_v28  ;;  %v925_v47 = vmul.f32 %v1611_v41, %v1906_v29  ;;  %v926_v49 = vmul.f32 %v1611_v41, %v1908_v30 }
 0x3ee   : > { %v927_v42 = vmul.f32 %v1611_v41, %v1910_v31  ;;  %v928_v0 = vmul.f32 %v1611_v41, %v1912_v32  ;;  %v929_v1 = vmul.f32 %v1611_v41, %v1914_v33  ;;  %v930_v2 = vmul.f32 %v1611_v41, %v1916_v34 }
 0x3ef   : > { %v935_v13 = vmul.f32 %v934_v40, %v923_v45  ;;  %v936_v3 = vmul.f32 %v934_v40, %v924_v46  ;;  %v937_v4 = vmul.f32 %v934_v40, %v925_v47  ;;  %v938_v48 = vmul.f32 %v934_v40, %v926_v49 }
 0x3f0   : > { %v939_v27 = vmul.f32 %v934_v40, %v927_v42  ;;  %v940_v28 = vmul.f32 %v934_v40, %v928_v0  ;;  %v941_v29 = vmul.f32 %v934_v40, %v929_v1  ;;  %v942_v30 = vmul.f32 %v934_v40, %v930_v2 }
 0x3f1   : > { %v947_v31 = vadd.f32 %v1971_v43, %v935_v13  ;;  %v948_v32 = vadd.f32 %v1971_v43, %v936_v3  ;;  %v949_v33 = vadd.f32 %v1971_v43, %v937_v4  ;;  %v950_v34 = vadd.f32 %v1971_v43, %v938_v48 }
 0x3f2   : > { %v951_v50 = vadd.f32 %v1971_v43, %v939_v27  ;;  %v952_v51 = vadd.f32 %v1971_v43, %v940_v28  ;;  %v953_v52 = vadd.f32 %v1971_v43, %v941_v29  ;;  %v954_v53 = vadd.f32 %v1971_v43, %v942_v30 }
 0x3f3   : > { %955 = vst [vmem:[%s1984_s10] sm:$0xff] %v947_v31  ;;  %956 = vst [vmem:[%s1984_s10 + $0x8] sm:$0xff] %v948_v32  ;;  %v1005_v55 = vadd.f32 %v1004_v54, %v1003_v44 }
 0x3f4   : > { %957 = vst [vmem:[%s1984_s10 + $0x10] sm:$0xff] %v949_v33  ;;  %958 = vst [vmem:[%s1984_s10 + $0x18] sm:$0xff] %v950_v34 }
 0x3f5   : > { %959 = vst [vmem:[%s1984_s10 + $0x20] sm:$0xff] %v951_v50  ;;  %960 = vst [vmem:[%s1984_s10 + $0x28] sm:$0xff] %v952_v51  ;;  %v1006_v7 = vmul.f32 0.015625, %v1005_v55 }
 0x3f6   : > { %961 = vst [vmem:[%s1984_s10 + $0x30] sm:$0xff] %v953_v52  ;;  %962 = vst [vmem:[%s1984_s10 + $0x38] sm:$0xff] %v954_v53 }
 0x3f7   : > { %v1007_v9 = vadd.f32 1e-05, %v1006_v7 }
 0x3f9   : > { %1612 = vrsqrt.f32 %v1007_v9 }
 0x403   : > { %v1613_v61 = vpop.eup %1612 }
 0x404   : > { %v1009_v8 = vmul.f32 %v1613_v61, %v1934_v56  ;;  %v1010_v63 = vmul.f32 %v1613_v61, %v1936_v57  ;;  %v1011_v10 = vmul.f32 %v1613_v61, %v1938_v58  ;;  %v1012_v11 = vmul.f32 %v1613_v61, %v1940_v5 }
 0x405   : > { %v1013_v12 = vmul.f32 %v1613_v61, %v1942_v59  ;;  %v1014_v14 = vmul.f32 %v1613_v61, %v1944_v6  ;;  %v1015_v15 = vmul.f32 %v1613_v61, %v1946_v60  ;;  %v1016_v16 = vmul.f32 %v1613_v61, %v1948_v62 }
 0x406   : > { %v1017_v17 = vmul.f32 %v1009_v8, %v934_v40  ;;  %v1018_v18 = vmul.f32 %v1010_v63, %v934_v40  ;;  %v1019_v19 = vmul.f32 %v1011_v10, %v934_v40  ;;  %v1020_v56 = vmul.f32 %v1012_v11, %v934_v40 }
 0x407   : > { %v1021_v57 = vmul.f32 %v1013_v12, %v934_v40  ;;  %v1022_v58 = vmul.f32 %v1014_v14, %v934_v40  ;;  %v1023_v5 = vmul.f32 %v1015_v15, %v934_v40  ;;  %v1024_v59 = vmul.f32 %v1016_v16, %v934_v40 }
 0x408   : > { %v1025_v6 = vadd.f32 %v1017_v17, %v1971_v43  ;;  %v1026_v60 = vadd.f32 %v1018_v18, %v1971_v43  ;;  %v1027_v62 = vadd.f32 %v1019_v19, %v1971_v43  ;;  %v1028_v20 = vadd.f32 %v1020_v56, %v1971_v43 }
 0x409   : > { %v1029_v21 = vadd.f32 %v1021_v57, %v1971_v43  ;;  %v1030_v22 = vadd.f32 %v1022_v58, %v1971_v43  ;;  %v1031_v23 = vadd.f32 %v1023_v5, %v1971_v43  ;;  %v1032_v24 = vadd.f32 %v1024_v59, %v1971_v43 }
 0x40a   : > { %1110 = vst [vmem:[%s1984_s10 + $0x40] sm:$0xff] %v1025_v6  ;;  %1111 = vst [vmem:[%s1984_s10 + $0x48] sm:$0xff] %v1026_v60 }
 0x40b   : > { %1112 = vst [vmem:[%s1984_s10 + $0x50] sm:$0xff] %v1027_v62  ;;  %1113 = vst [vmem:[%s1984_s10 + $0x58] sm:$0xff] %v1028_v20 }
 0x40c   : > { %1114 = vst [vmem:[%s1984_s10 + $0x60] sm:$0xff] %v1029_v21  ;;  %1115 = vst [vmem:[%s1984_s10 + $0x68] sm:$0xff] %v1030_v22 }
 0x40d   : > { %1116 = vst [vmem:[%s1984_s10 + $0x70] sm:$0xff] %v1031_v23  ;;  %1117 = vst [vmem:[%s1984_s10 + $0x78] sm:$0xff] %v1032_v24 }
 0x40e PF: > { %s15_s18 = sadd.s32 1, %s1620_s18  }
 0x40f   : > { %p12_p5 = scmp.ge.s32.totalorder %s15_s18, 6  }
 0x411   :  { %14 = sbr.rel (!%p12_p5) target bundleno = 1 (0x1), region = 71 }

</bundles_post_ra>
